<compile_context>
chip_gen: v6e
topology: v6e:2x2x1
jax: 0.10.0
libtpu: 0.0.40
codegen_flags: <defaults>
</compile_context>

<pallas_src>
import jax
import jax.numpy as jnp
from jax.experimental import pallas as pl
from jax.experimental.pallas import tpu as pltpu


def _sharpness_kernel(alpha_ref, x_ref, o_ref):
    # alpha_ref: SMEM (1, 1) f32, alpha = 1 - mag
    # x_ref / o_ref: VMEM (block_p, H, W)
    x = x_ref[...].astype(jnp.float32)
    _, H, W = x.shape  # static block shape

    # ---- W (lane) direction: reflect 3-tap sum  row[j] = x[j-1] + x[j] + x[j+1]
    # PyTorch 'reflect' pad: index -1 -> 1, index W -> W-2.
    if W % 128 == 0:
        # Lane-aligned width: neighbour taps via XLU rotates (no realigned
        # full-block slice copies).  The two reflected border columns are
        # patched with 1-wide slices + where masks; the fix is written so it is
        # correct regardless of the roll direction convention.
        a = pltpu.roll(x, shift=1, axis=2)
        b = pltpu.roll(x, shift=W - 1, axis=2)
        col = jax.lax.broadcasted_iota(jnp.int32, x.shape, 2)
        lfix = x[:, :, 1:2] - x[:, :, W - 1:W]        # col 0 wants x0 + 2*x1
        rfix = x[:, :, W - 2:W - 1] - x[:, :, 0:1]    # col W-1 wants x_{W-1}+2*x_{W-2}
        row = x + a + b + jnp.where(col == 0, lfix,
                                    jnp.where(col == W - 1, rfix, 0.0))
    else:
        # Unaligned width (e.g. 16): concat of lane slices; edge column carries
        # the reflection.
        left = jnp.concatenate([x[:, :, 1:2], x[:, :, :W - 1]], axis=2)
        right = jnp.concatenate([x[:, :, 1:], x[:, :, W - 2:W - 1]], axis=2)
        row = x + left + right

    # ---- H (sublane) direction on the row sums: s = col3(row3(x))
    up = jnp.concatenate([row[:, 1:2, :], row[:, :H - 1, :]], axis=1)
    down = jnp.concatenate([row[:, 1:, :], row[:, H - 2:H - 1, :]], axis=1)
    s = row + up + down

    # blur = conv3x3(x, [[1,1,1],[1,5,1],[1,1,1]] / 13); s already holds x once.
    blur = (s + 4.0 * x) * (1.0 / 13.0)

    # Blend: blur + alpha * (x - blur), alpha = 1 - mag; clamp to [0, 1].
    alpha = alpha_ref[0, 0]
    out = blur + alpha * (x - blur)
    o_ref[...] = jnp.clip(out, 0.0, 1.0).astype(o_ref.dtype)


def _vmem_capacity_bytes():
    """Per-core VMEM capacity; conservative fallback if the query fails."""
    try:
        info = pltpu.get_tpu_info()
        cap = getattr(info, "vmem_capacity_bytes", None)
        if cap:
            return int(cap)
    except Exception:
        pass
    return 64 * 1024 * 1024  # v7x per-TensorCore VMEM (v5e/v6e have 128 MiB)


_TARGET_BLOCK_IN_BYTES = 4 << 20  # ~4 MiB of input pixels per grid step


def _plan_blocks(P, H, W, itemsize, vmem_cap):
    """Pick planes-per-block, grid length and a VMEM limit.

    Uses the lane/sublane-PADDED plane size (f32 compute inside the kernel)
    so the VMEM accounting survives small-W shapes.
    """
    pH = -(-H // 8) * 8          # sublane padding (f32 tile)
    pW = -(-W // 128) * 128      # lane padding
    plane_in = pH * pW * itemsize
    plane_f32 = pH * pW * 4

    # Per plane of a block: double-buffered input + output (input dtype) plus a
    # conservative ~8 block-sized f32 temporaries inside the body.
    per_plane = 4 * plane_in + 8 * plane_f32

    budget = int(vmem_cap * 0.6)  # leave room for Mosaic internal scratch
    bp = min(max(1, _TARGET_BLOCK_IN_BYTES // plane_in),
             max(1, budget // per_plane),
             P)
    # Keep at least 2 grid steps so dimension_semantics=("parallel",) can split
    # the work across both TensorCores on v7x (no-op on v5e/v6e).
    if P > 1:
        bp = min(bp, -(-P // 2))
    bp = max(1, int(bp))

    grid_len = int(pl.cdiv(P, bp))  # partial last block is fine (per-plane op)

    need = bp * per_plane
    vmem_limit = int(min(int(0.9 * vmem_cap), max(32 << 20, need + (16 << 20))))
    return bp, grid_len, vmem_limit


def sharpness_layer(x, params, *, donate_x=False):
    """SharpnessLayer training forward.

    x:      (N, C, H, W) float array (image values expected in [0, 1]).
    params: (1,) float array (the learned nn.Parameter).
    donate_x: alias x's HBM buffer to the output (safe: disjoint blocks, each
      input block is fully read before its output block is written).
    """
    N, C, H, W = x.shape
    if N == 0:
        return x
    assert H >= 2 and W >= 2, "reflect padding of 1 needs H, W >= 2"

    # mag = activation(params); blend alpha = 1 - mag (scalar, XLA-side).
    mag = (jnp.tanh(params.astype(jnp.float32)) + 1.0) * 0.5
    alpha = (1.0 - mag).reshape(1, 1).astype(jnp.float32)

    P = N * C
    xf = x.reshape(P, H, W)

    bp, grid_len, vmem_limit = _plan_blocks(P, H, W, x.dtype.itemsize,
                                            _vmem_capacity_bytes())

    extra = {}
    if donate_x:
        extra["input_output_aliases"] = {1: 0}

    out = pl.pallas_call(
        _sharpness_kernel,
        out_shape=jax.ShapeDtypeStruct((P, H, W), x.dtype),
        grid_spec=pltpu.PrefetchScalarGridSpec(
            num_scalar_prefetch=0,
            grid=(grid_len,),
            in_specs=[
                pl.BlockSpec(memory_space=pltpu.MemorySpace.SMEM),  # alpha (1,1)
                pl.BlockSpec((bp, H, W), lambda p: (p, 0, 0)),      # planes
            ],
            out_specs=pl.BlockSpec((bp, H, W), lambda p: (p, 0, 0)),
        ),
        compiler_params=pltpu.CompilerParams(
            dimension_semantics=("parallel",),
            vmem_limit_bytes=vmem_limit,
        ),
        **extra,
    )(alpha, xf)

    return out.reshape(N, C, H, W)


def sharpness_layer_ref(x, params):
    """Pure-JAX reference matching the PyTorch SharpnessLayer training forward."""
    N, C, H, W = x.shape
    mag = (jnp.tanh(params.astype(jnp.float32)) + 1.0) * 0.5
    alpha = (1.0 - mag).reshape(-1, 1, 1, 1)

    kernel = jnp.ones((3, 3), jnp.float32).at[1, 1].set(5.0) / 13.0
    k = jnp.broadcast_to(kernel, (C, 1, 3, 3))

    xp = jnp.pad(x.astype(jnp.float32), ((0, 0), (0, 0), (1, 1), (1, 1)),
                 mode="reflect")
    blur = jax.lax.conv_general_dilated(
        xp, k, window_strides=(1, 1), padding="VALID",
        dimension_numbers=("NCHW", "OIHW", "NCHW"), feature_group_count=C)
    out = blur + alpha * (x.astype(jnp.float32) - blur)
    return jnp.clip(out, 0.0, 1.0).astype(x.dtype)


if __name__ == "__main__":
    key = jax.random.PRNGKey(0)
    k1, k2 = jax.random.split(key)
    x = jax.random.uniform(k1, (2, 4, 16, 16), dtype=jnp.float32)   # image in [0,1)
    params = jax.random.uniform(k2, (1,), dtype=jnp.float32)        # torch.rand(1)

    out = sharpness_layer(x, params)
    out = jax.block_until_ready(out)

    ref = sharpness_layer_ref(x, params)
    assert out.shape == (2, 4, 16, 16)
    assert jnp.allclose(out, ref, atol=1e-5, rtol=1e-5), "mismatch vs reference"

    print("KERNEL_OK")
</pallas_src>

<mosaic_0001>
module attributes {stable_mosaic.version = 11 : i64} {
  func.func @_sharpness_kernel(%arg0: i32, %arg1: memref<1x1xf32, #tpu.memory_space<smem>>, %arg2: memref<4x16x16xf32, #tpu.memory_space<vmem>>, %arg3: memref<4x16x16xf32, #tpu.memory_space<vmem>>) attributes {dimension_semantics = [#tpu.dimension_semantics<parallel>], iteration_bounds = array<i64: 2>, scalar_prefetch = 0 : i64, scratch_operands = 0 : i64, tpu.core_type = #tpu.core_type<tc>, window_params = [{transform_indices = @transform_0, window_bounds = array<i64: 1, 1>}, {transform_indices = @transform_1, window_bounds = array<i64: 4, 16, 16>}, {transform_indices = @transform_2, window_bounds = array<i64: 4, 16, 16>}]} {
    %c0 = arith.constant 0 : index
    %c0_0 = arith.constant 0 : index
    %c0_1 = arith.constant 0 : index
    %0 = vector.load %arg2[%c0, %c0_0, %c0_1] : memref<4x16x16xf32, #tpu.memory_space<vmem>>, vector<4x16x16xf32>
    %1 = vector.extract_strided_slice %0 {offsets = [0, 0, 1], sizes = [4, 16, 1], strides = [1, 1, 1]} : vector<4x16x16xf32> to vector<4x16x1xf32>
    %2 = vector.extract_strided_slice %0 {offsets = [0, 0, 0], sizes = [4, 16, 15], strides = [1, 1, 1]} : vector<4x16x16xf32> to vector<4x16x15xf32>
    %3 = tpu.concatenate %1, %2 in 2 : vector<4x16x1xf32>, vector<4x16x15xf32> -> vector<4x16x16xf32>
    %4 = vector.extract_strided_slice %0 {offsets = [0, 0, 1], sizes = [4, 16, 15], strides = [1, 1, 1]} : vector<4x16x16xf32> to vector<4x16x15xf32>
    %5 = vector.extract_strided_slice %0 {offsets = [0, 0, 14], sizes = [4, 16, 1], strides = [1, 1, 1]} : vector<4x16x16xf32> to vector<4x16x1xf32>
    %6 = tpu.concatenate %4, %5 in 2 : vector<4x16x15xf32>, vector<4x16x1xf32> -> vector<4x16x16xf32>
    %7 = arith.addf %0, %3 : vector<4x16x16xf32>
    %8 = arith.addf %7, %6 : vector<4x16x16xf32>
    %9 = vector.extract_strided_slice %8 {offsets = [0, 1, 0], sizes = [4, 1, 16], strides = [1, 1, 1]} : vector<4x16x16xf32> to vector<4x1x16xf32>
    %10 = vector.extract_strided_slice %8 {offsets = [0, 0, 0], sizes = [4, 15, 16], strides = [1, 1, 1]} : vector<4x16x16xf32> to vector<4x15x16xf32>
    %11 = tpu.concatenate %9, %10 in 1 : vector<4x1x16xf32>, vector<4x15x16xf32> -> vector<4x16x16xf32>
    %12 = vector.extract_strided_slice %8 {offsets = [0, 1, 0], sizes = [4, 15, 16], strides = [1, 1, 1]} : vector<4x16x16xf32> to vector<4x15x16xf32>
    %13 = vector.extract_strided_slice %8 {offsets = [0, 14, 0], sizes = [4, 1, 16], strides = [1, 1, 1]} : vector<4x16x16xf32> to vector<4x1x16xf32>
    %14 = tpu.concatenate %12, %13 in 1 : vector<4x15x16xf32>, vector<4x1x16xf32> -> vector<4x16x16xf32>
    %15 = arith.addf %8, %11 : vector<4x16x16xf32>
    %16 = arith.addf %15, %14 : vector<4x16x16xf32>
    %cst = arith.constant 4.000000e+00 : f32
    %17 = vector.broadcast %cst : f32 to vector<4x16x16xf32>
    %18 = arith.mulf %17, %0 : vector<4x16x16xf32>
    %19 = arith.addf %16, %18 : vector<4x16x16xf32>
    %cst_2 = arith.constant 0.0769230798 : f32
    %20 = vector.broadcast %cst_2 : f32 to vector<4x16x16xf32>
    %21 = arith.mulf %19, %20 : vector<4x16x16xf32>
    %c0_3 = arith.constant 0 : index
    %c0_4 = arith.constant 0 : index
    %22 = memref.load %arg1[%c0_3, %c0_4] : memref<1x1xf32, #tpu.memory_space<smem>>
    %23 = arith.subf %0, %21 : vector<4x16x16xf32>
    %24 = vector.broadcast %22 : f32 to vector<4x16x16xf32>
    %25 = arith.mulf %24, %23 : vector<4x16x16xf32>
    %26 = arith.addf %21, %25 : vector<4x16x16xf32>
    %cst_5 = arith.constant 0.000000e+00 : f32
    %cst_6 = arith.constant 1.000000e+00 : f32
    %27 = vector.broadcast %cst_5 : f32 to vector<4x16x16xf32>
    %28 = arith.maximumf %27, %26 : vector<4x16x16xf32>
    %29 = vector.broadcast %cst_6 : f32 to vector<4x16x16xf32>
    %30 = arith.minimumf %29, %28 : vector<4x16x16xf32>
    %c0_7 = arith.constant 0 : index
    %c0_8 = arith.constant 0 : index
    %c0_9 = arith.constant 0 : index
    %31 = vector.load %arg3[%c0_7, %c0_8, %c0_9] : memref<4x16x16xf32, #tpu.memory_space<vmem>>, vector<4x16x16xf32>
    tpu.vector_store %arg3[%c0_7, %c0_8, %c0_9], %30 {strides = array<i32>} : memref<4x16x16xf32, #tpu.memory_space<vmem>>, vector<4x16x16xf32>,
    return
  }
  func.func @transform_0(%arg0: i32) -> (i32, i32) {
    %c0_i32 = arith.constant 0 : i32
    %c0_i32_0 = arith.constant 0 : i32
    %c0_i32_1 = arith.constant 0 : i32
    return %c0_i32, %c0_i32_0 : i32, i32
  }
  func.func @transform_1(%arg0: i32) -> (i32, i32, i32) {
    %c0_i32 = arith.constant 0 : i32
    %c0_i32_0 = arith.constant 0 : i32
    %c0_i32_1 = arith.constant 0 : i32
    return %arg0, %c0_i32, %c0_i32_0 : i32, i32, i32
  }
  func.func @transform_2(%arg0: i32) -> (i32, i32, i32) {
    %c0_i32 = arith.constant 0 : i32
    %c0_i32_0 = arith.constant 0 : i32
    %c0_i32_1 = arith.constant 0 : i32
    return %arg0, %c0_i32, %c0_i32_0 : i32, i32, i32
  }
}

</mosaic_0001>

<bundles_post_ra>
// kernel: tpu_custom_call.1
= control target key start
LH: loop header
LB: loop body
LE: loop exit
PB: predicated region body
PF: predicated region fallthrough
CT: control target
= control target key end

     0   :  { %s996_s0 = inlined_call_operand.<no memory space> [shape: f32[1,1], index: 0, kind: input, shape index: {}]   ;;  %s997_s1 = inlined_call_operand.hbm [shape: f32[8,16,16], index: 1, kind: input, shape index: {}]   ;;  %s998_s2 = inlined_call_operand.hbm [shape: f32[8,16,16], index: 2, kind: output, shape index: {}]  }
   0x1   :  { %7 = sst [smem:[#allocation2]] %s996_s0 }
   0x2   :  { %8 = vsyncpa [#allocation4], 0 }
   0x3   :  { %10 = vsyncpa [#allocation4 + $0x1], 0 }
   0x4   :  { %11 = vsyncpa [#allocation5], 0 }
   0x5   :  { %13 = vsyncpa [#allocation5 + $0x1], 0  ;;  %s701_s11 = smov 0   ;;  %s703_s12 = smov 0  }
   0x6   :  { %s705_s13 = smov 0   ;;  %s707_s14 = smov 0  }
   0x7 LB: > { %s722_s0 = sadd.s32 4294967295, %s673_s14   ;;  %s509_s15 = sadd.s32 4294967294, %s673_s14   ;;  %s673_s14 = sphi %s707_s14, %s1013_s14   ;;  %s669_s13 = sphi %s705_s13, %s1012_s13   ;;  %s665_s12 = sphi %s703_s12, %s1011_s12   ;;  %s661_s11 = sphi %s701_s11, %s1010_s11  }
   0x8   : > { %s726_s16 = sadd.s32 1, %s673_s14   ;;  %s47_s17 = sadd.s32 1, %s669_s13 }
   0x9   : > { %s44_s18 = ssub.s32 %s673_s14, %s726_s16  ;;  %p54_p0 = scmp.ne.s32.totalorder %s669_s13, %s665_s12 }
   0xa   : > { %p45_p1 = scmp.eq.s32.totalorder %s44_s18, 0  ;;  %p55_p2 = scmp.eq.s32.totalorder %s673_s14, 0 }
   0xb   : > { %p60_p3 = scmp.ne.s32.totalorder %s665_s12, %s661_s11  ;;  %p61_p4 = scmp.eq.s32.totalorder %s722_s0, 0 }
   0xc   : > { %s738_s19 = scalar_select %p45_p1, %s669_s13, %s47_s17  }
   0xd   : > { %p740_p5 = por %p55_p2, %p54_p0  ;;  %p744_p6 = por %p61_p4, %p60_p3 }
   0xe   : > { %p84_p7 = scmp.eq.s32.totalorder %s722_s0, 1  ;;  %p90_p8 = scmp.eq.s32.totalorder %s509_s15, 1 }
   0xf   : > { %s1002_s21 = scalar_select %p744_p6, 1, 0 }
  0x10   : > { %p541_p10 = scmp.lt.s32.totalorder %s673_s14, 2  ;;  %p751_p11 = por %p84_p7, %p54_p0 }
  0x11   : > { %p755_p12 = por %p90_p8, %p60_p3  ;;  %s113_s24 = sand.u32 1, %s669_s13  }
  0x12   : > { %s1003_s22 = scalar_select %p751_p11, 1, 0 }
  0x13   : > { %s1004_s23 = scalar_select %p755_p12, 1, 0 }
  0x14   : > { %s526_s25 = sshll.u32 %s673_s14, 10  ;;  %s512_s26 = sshll.u32 %s113_s24, 6 }
  0x15   : > { %s764_s29 = scalar_lea.hbm %s997_s1, %s526_s25  ;;  %s117_s30 = scalar_lea.vmem [#allocation3], %s512_s26 }
  0x16   : > { %s125_s3 = sshll.u32 %s117_s30, 4  ;;  %p768_p13 = pnand %p541_p10, %p740_p5  ;;  %s772_s3 = int_to_ptr.vmem [resolvable:$true] %s125_s3 }
  0x17   : > { %s774_s5 = scalar_lea.sflag [#allocation4], %s113_s24  ;;  %s581_s6 = scalar_lea.hbm %s764_s29, 1024 }
  0x18   : > { %p582_p0 = scmp.ne.s32.totalorder %s764_s29, %s581_s6  ;;  %p583_p1 = pneg %p768_p13 }
  0x19   : > { %s586_s9 = scalar_lea.hbm %s997_s1, 2048  ;;  %p587_p4 = scmp.lt.s32.totalorder %s764_s29, %s997_s1 }
  0x1a   : > { %p584_p2 = pnand %p583_p1, %p582_p0  ;;  %p588_p5 = scmp.lt.s32.totalorder %s586_s9, %s581_s6 }
  0x1c   : > { %p585_p3 = pneg %p584_p2  ;;  %p589_p7 = por %p588_p5, %p587_p4 }
  0x1e   : > { %p590_p8 = pnand %p589_p7, %p585_p3 }
  0x20   : > { %593 = shalt.err (!%p590_p8)
}
  0x21   : > { %s594_s17 = scalar_lea.vmem %s772_s3, 1024  ;;  %s675_s18 = smov [#allocation3]  }
  0x22   : > { %p595_p10 = scmp.ne.s32.totalorder %s772_s3, %s594_s17  ;;  %s599_s20 = sshll.u32 %s675_s18, 4  ;;  %s600_s20 = int_to_ptr.vmem [resolvable:$false] %s599_s20 }
  0x23   : > { %s601_s24 = scalar_lea.vmem %s600_s20, 2048  ;;  %p602_p2 = scmp.lt.s32.totalorder %s772_s3, %s600_s20 }
  0x24   : > { %p597_p9 = pnand %p595_p10, %p583_p1  ;;  %p603_p12 = scmp.lt.s32.totalorder %s601_s24, %s594_s17 }
  0x26   : > { %p598_p0 = pneg %p597_p9  ;;  %p604_p11 = por %p603_p12, %p602_p2 }
  0x28   : > { %p605_p6 = pnand %p604_p11, %p598_p0 }
  0x2a   : > { %608 = shalt.err (!%p605_p6)
}
  0x2b   : > { %s676_s25 = smov 128   ;;  %s677_s26 = smov 8  }
  0x2c   : > { %536 = dma.hbm_to_vmem [thread:$0]  (!%p768_p13), %s764_s29, 1024, %s772_s3, %s774_s5, %s676_s25, %s676_s25, %s677_s26  }
  0x2d   : > { %p516_p9 = scmp.ge.s32.totalorder %s673_s14, 1  ;;  %p133_p1 = scmp.lt.s32.totalorder %s673_s14, 3 }
  0x2f   : > { %p134_p3 = pnand %p516_p9, %p133_p1 }
  0x30   : > { %s798_s27 = sand.u32 (!%p134_p3), 1, %s665_s12   ;;  %p1006_p6 = scmp.ne.s32.totalorder (!%p134_p3), %s1002_s21, 0 }
  0x31   : > { %137 = sbr.rel (%p134_p3) target bundleno = 249 (0xf9), region = 28  ;;  %s517_s28 = sshll.u32 (!%p134_p3), %s798_s27, 6 }
  0x32   : > { %s140_s30 = scalar_lea.sflag (!%p134_p3), [#allocation4], %s798_s27  ;;  %s143_s6 = scalar_lea.vmem (!%p134_p3), [#allocation3], %s517_s28 }
  0x36   : > { %652 = dma.done.wait (%p1006_p6), %s140_s30, 1024  }
  0x37   : > { %654 = vsyncadd (%p1006_p6), %s140_s30, 4294966272  ;;  %v808_v0 = vld [vmem:[%s143_s6 + $0x10] sm:$0xff]  ;;  %v810_v1 = vld [vmem:[%s143_s6] sm:$0xff]  ;;  %s678_s29 = smov 127   ;;  %s679_s21 = smov 1   ;;  %vm230_vm0 = vcmask 7168  }
  0x38   : > { %186 = vrot.lane.b32.xlu1 %v808_v0, %s678_s29  ;;  %182 = vrot.lane.b32.xlu0 %v810_v1, %s678_s29  ;;  %v814_v2 = vld [vmem:[%s143_s6 + $0x18] sm:$0xff]  ;;  %v816_v3 = vld [vmem:[%s143_s6 + $0x8] sm:$0xff]  ;;  %s370_s3 = sld [smem:[#allocation2]]  ;;  %vm239_vm1 = vcmask 121856   ;;  %vm305_vm2 = vcmask 1046528   ;;  %v849_v22 = vmul.f32 4.0, %v808_v0 }
  0x39   : > { %v820_v4 = vld [vmem:[%s143_s6 + $0x28] sm:$0xff]  ;;  %v822_v5 = vld [vmem:[%s143_s6 + $0x20] sm:$0xff]  ;;  %v826_v6 = vld [vmem:[%s143_s6 + $0x38] sm:$0xff]  ;;  %v346_v23 = vmul.f32 4.0, %v810_v1  ;;  %v855_v26 = vmul.f32 4.0, %v814_v2  ;;  %v347_v27 = vmul.f32 4.0, %v816_v3 }
  0x3a   : > { %v828_v7 = vld [vmem:[%s143_s6 + $0x30] sm:$0xff]  ;;  %v859_v32 = vmul.f32 4.0, %v820_v4  ;;  %vm280_vm3 = vcmask 1040384   ;;  %v864_v39 = vmul.f32 4.0, %v822_v5  ;;  %vm412_vm4 = vcmask 130048   ;;  %s912_s4 = scalar_lea.vmem [#allocation6], %s517_s28 }
  0x3b   : > { %s528_s5 = sshll.u32 %s722_s0, 10  ;;  %s436_s7 = sshll.u32 %s912_s4, 4  ;;  %s949_s7 = int_to_ptr.vmem [resolvable:$true] %s436_s7 }
  0x3c   : > { %188 = vrot.lane.b32.xlu1 %v814_v2, %s678_s29  ;;  %184 = vrot.lane.b32.xlu0 %v816_v3, %s678_s29  ;;  %s947_s10 = scalar_lea.hbm %s998_s2, %s528_s5  ;;  %s422_s0 = scalar_lea.sflag [#allocation5], %s798_s27 }
  0x3d   : > { %s609_s15 = scalar_lea.vmem %s949_s7, 1024  ;;  %p1007_p12 = scmp.ne.s32.totalorder %s1003_s22, 0 }
  0x3e   : > { %v866_v40 = vstv %s370_s3  ;;  %p610_p11 = scmp.ne.s32.totalorder %s949_s7, %s609_s15  ;;  %s680_s17 = smov [#allocation6]  }
  0x3f   : > { %s613_s18 = sshll.u32 %s680_s17, 4  ;;  %s614_s18 = int_to_ptr.vmem [resolvable:$false] %s613_s18 }
  0x40   : > { %192 = vrot.lane.b32.xlu1 %v820_v4, %s678_s29  ;;  %190 = vrot.lane.b32.xlu0 %v822_v5, %s678_s29  ;;  %p611_p13 = pnand %p610_p11, %p1007_p12  ;;  %s615_s20 = scalar_lea.vmem %s614_s18, 2048 }
  0x41   : > { %p616_p5 = scmp.lt.s32.totalorder %s949_s7, %s614_s18  ;;  %p617_p7 = scmp.lt.s32.totalorder %s615_s20, %s609_s15 }
  0x42   : > { %p612_p4 = pneg %p611_p13 }
  0x43   : > { %p618_p8 = por %p617_p7, %p616_p5 }
  0x44   : > { %196 = vrot.lane.b32.xlu1 %v826_v6, %s678_s29  ;;  %194 = vrot.lane.b32.xlu0 %v828_v7, %s678_s29 }
  0x45   : > { %p619_p10 = pnand %p618_p8, %p612_p4 }
  0x48   : > { %208 = vrot.lane.b32.xlu1 %v816_v3, %s679_s21  ;;  %206 = vrot.lane.b32.xlu0 %v810_v1, %s679_s21 }
  0x4c   : > { %212 = vrot.lane.b32.xlu1 %v814_v2, %s679_s21  ;;  %210 = vrot.lane.b32.xlu0 %v808_v0, %s679_s21 }
  0x50   : > { %216 = vrot.lane.b32.xlu1 %v820_v4, %s679_s21  ;;  %214 = vrot.lane.b32.xlu0 %v822_v5, %s679_s21 }
  0x54   : > { %220 = vrot.lane.b32.xlu1 %v826_v6, %s679_s21  ;;  %218 = vrot.lane.b32.xlu0 %v828_v7, %s679_s21 }
  0xaa   : > { %v187_v8 = vpop.permute.xlu1 %186  ;;  %v183_v9 = vpop.permute.xlu0 %182 }
  0xae   : > { %v189_v10 = vpop.permute.xlu1 %188  ;;  %v185_v11 = vpop.permute.xlu0 %184 }
  0xb2   : > { %v193_v12 = vpop.permute.xlu1 %192  ;;  %v191_v13 = vpop.permute.xlu0 %190 }
  0xb6   : > { %v840_v14 = vpop.permute.xlu1 %196  ;;  %v842_v15 = vpop.permute.xlu0 %194 }
  0xba   : > { %v209_v16 = vpop.permute.xlu1 %208  ;;  %v207_v17 = vpop.permute.xlu0 %206 }
  0xbb   : > { %v232_v18 = vsel %vm230_vm0, %v185_v11, %v209_v16  ;;  %v231_v19 = vsel %vm230_vm0, %v183_v9, %v207_v17  ;;  %v241_v24 = vsel %vm239_vm1, %v185_v11, %v209_v16  ;;  %v240_v25 = vsel %vm239_vm1, %v183_v9, %v207_v17 }
  0xbc   : > { %v249_v20 = vadd.f32 %v232_v18, %v816_v3  ;;  %v248_v21 = vadd.f32 %v231_v19, %v810_v1 }
  0xbe   : > { %v257_v28 = vadd.f32 %v249_v20, %v241_v24  ;;  %v256_v29 = vadd.f32 %v248_v21, %v240_v25  ;;  %v213_v30 = vpop.permute.xlu1 %212  ;;  %v211_v31 = vpop.permute.xlu0 %210 }
  0xbf   : > { %v234_v33 = vsel %vm230_vm0, %v189_v10, %v213_v30  ;;  %v233_v34 = vsel %vm230_vm0, %v187_v8, %v211_v31  ;;  %v243_v45 = vsel %vm239_vm1, %v189_v10, %v213_v30  ;;  %v242_v46 = vsel %vm239_vm1, %v187_v8, %v211_v31 }
  0xc0   : > { %v282_v35 = vrot.slane %v257_v28, 7  ;;  %v306_v36 = vrot.slane %v257_v28, 1  ;;  %v268_v37 = vrot.slane %v256_v29, 1  ;;  %v281_v38 = vrot.slane %v256_v29, 7 }
  0xc1   : > { %v251_v41 = vadd.f32 %v234_v33, %v814_v2  ;;  %v250_v42 = vadd.f32 %v233_v34, %v808_v0 }
  0xc2   : > { %v283_v43 = vsel %vm280_vm3, %v281_v38, %v282_v35  ;;  %v301_v44 = vsel %vm280_vm3, %v268_v37, %v281_v38  ;;  %v217_v47 = vpop.permute.xlu1 %216  ;;  %v215_v48 = vpop.permute.xlu0 %214  ;;  %v326_v53 = vsel %vm305_vm2, %v306_v36, %v282_v35  ;;  %v307_v54 = vsel %vm305_vm2, %v268_v37, %v306_v36 }
  0xc3   : > { %v330_v49 = vadd.f32 %v301_v44, %v256_v29  ;;  %v331_v50 = vadd.f32 %v283_v43, %v257_v28  ;;  %v259_v51 = vadd.f32 %v251_v41, %v243_v45  ;;  %v258_v52 = vadd.f32 %v250_v42, %v242_v46 }
  0xc4   : > { %v236_v55 = vsel %vm230_vm0, %v193_v12, %v217_v47  ;;  %v235_v56 = vsel %vm230_vm0, %v191_v13, %v215_v48  ;;  %v245_v11 = vsel %vm239_vm1, %v193_v12, %v217_v47  ;;  %v244_v16 = vsel %vm239_vm1, %v191_v13, %v215_v48 }
  0xc5   : > { %v338_v57 = vadd.f32 %v330_v49, %v307_v54  ;;  %v339_v58 = vadd.f32 %v331_v50, %v326_v53  ;;  %v285_v59 = vrot.slane %v259_v51, 7  ;;  %v308_v60 = vrot.slane %v259_v51, 1 }
  0xc6   : > { %v269_v61 = vrot.slane %v258_v52, 1  ;;  %v284_v62 = vrot.slane %v258_v52, 7  ;;  %v253_v63 = vadd.f32 %v236_v55, %v820_v4  ;;  %v252_v8 = vadd.f32 %v235_v56, %v822_v5  ;;  %v221_v17 = vpop.permute.xlu1 %220  ;;  %v219_v50 = vpop.permute.xlu0 %218 }
  0xc7   : > { %v354_v9 = vadd.f32 %v346_v23, %v338_v57  ;;  %v355_v10 = vadd.f32 %v347_v27, %v339_v58  ;;  %v327_v18 = vsel %vm305_vm2, %v308_v60, %v285_v59  ;;  %v238_v12 = vsel %vm230_vm0, %v840_v14, %v221_v17 }
  0xc8   : > { %v286_v19 = vsel %vm280_vm3, %v284_v62, %v285_v59  ;;  %v302_v20 = vsel %vm280_vm3, %v269_v61, %v284_v62  ;;  %v261_v21 = vadd.f32 %v253_v63, %v245_v11  ;;  %v309_v30 = vsel %vm305_vm2, %v269_v61, %v308_v60 }
  0xc9   : > { %v362_v24 = vmul.f32 0.07692308, %v354_v9  ;;  %v363_v25 = vmul.f32 0.07692308, %v355_v10  ;;  %v332_v28 = vadd.f32 %v302_v20, %v258_v52  ;;  %v333_v29 = vadd.f32 %v286_v19, %v259_v51 }
  0xca   : > { %v288_v23 = vrot.slane %v261_v21, 7  ;;  %v260_v27 = vadd.f32 %v252_v8, %v244_v16  ;;  %v310_v35 = vrot.slane %v261_v21, 1  ;;  %v255_v45 = vadd.f32 %v238_v12, %v826_v6 }
  0xcb   : > { %v371_v13 = vsub.f32 %v810_v1, %v362_v24  ;;  %v372_v31 = vsub.f32 %v816_v3, %v363_v25  ;;  %v340_v33 = vadd.f32 %v332_v28, %v309_v30  ;;  %v341_v34 = vadd.f32 %v333_v29, %v327_v18 }
  0xcc   : > { %v270_v36 = vrot.slane %v260_v27, 1  ;;  %v287_v37 = vrot.slane %v260_v27, 7  ;;  %v247_v3 = vsel %vm239_vm1, %v840_v14, %v221_v17  ;;  %v328_v51 = vsel %vm305_vm2, %v310_v35, %v288_v23 }
  0xcd   : > { %v380_v38 = vmul.f32 %v866_v40, %v371_v13  ;;  %v381_v41 = vmul.f32 %v866_v40, %v372_v31  ;;  %v356_v42 = vadd.f32 %v849_v22, %v340_v33  ;;  %v357_v43 = vadd.f32 %v855_v26, %v341_v34 }
  0xce   : > { %v289_v44 = vsel %vm280_vm3, %v287_v37, %v288_v23  ;;  %v303_v1 = vsel %vm280_vm3, %v270_v36, %v287_v37  ;;  %v311_v22 = vsel %vm305_vm2, %v270_v36, %v310_v35  ;;  %v263_v58 = vadd.f32 %v255_v45, %v247_v3 }
  0xcf   : > { %v388_v46 = vadd.f32 %v380_v38, %v362_v24  ;;  %v389_v47 = vadd.f32 %v381_v41, %v363_v25  ;;  %v364_v48 = vmul.f32 0.07692308, %v356_v42  ;;  %v365_v49 = vmul.f32 0.07692308, %v357_v43 }
  0xd0   : > { %v334_v52 = vadd.f32 %v303_v1, %v260_v27  ;;  %v335_v26 = vadd.f32 %v289_v44, %v261_v21  ;;  %v237_v59 = vsel %vm230_vm0, %v842_v15, %v219_v50  ;;  %v246_v11 = vsel %vm239_vm1, %v842_v15, %v219_v50 }
  0xd1   : > { %v396_v53 = vmax.f32 %v388_v46, 0.0  ;;  %v397_v54 = vmax.f32 %v389_v47, 0.0  ;;  %v373_v55 = vsub.f32 %v808_v0, %v364_v48  ;;  %v374_v14 = vsub.f32 %v814_v2, %v365_v49 }
  0xd2   : > { %v342_v56 = vadd.f32 %v334_v52, %v311_v22  ;;  %v343_v57 = vadd.f32 %v335_v26, %v328_v51  ;;  %v254_v0 = vadd.f32 %v237_v59, %v828_v7  ;;  %v291_v17 = vrot.slane %v263_v58, 7 }
  0xd3   : > { %v404_v60 = vmin.f32 %v396_v53, 1.0  ;;  %v405_v61 = vmin.f32 %v397_v54, 1.0  ;;  %v382_v62 = vmul.f32 %v866_v40, %v373_v55  ;;  %v383_v63 = vmul.f32 %v866_v40, %v374_v14 }
  0xd4   : > { %v358_v8 = vadd.f32 %v864_v39, %v342_v56  ;;  %v359_v9 = vadd.f32 %v859_v32, %v343_v57  ;;  %v262_v32 = vadd.f32 %v254_v0, %v246_v11  ;;  %v312_v20 = vrot.slane %v263_v58, 1 }
  0xd5   : > { %413 = vst.msk [vmem:[%s912_s4] sm:$0xff] %vm412_vm4, %v404_v60  ;;  %414 = vst.msk [vmem:[%s912_s4 + $0x8] sm:$0xff] %vm412_vm4, %v405_v61  ;;  %v390_v2 = vadd.f32 %v382_v62, %v364_v48  ;;  %v391_v10 = vadd.f32 %v383_v63, %v365_v49  ;;  %v353_v13 = vmul.f32 4.0, %v826_v6  ;;  %v352_v31 = vmul.f32 4.0, %v828_v7 }
  0xd6   : > { %v366_v16 = vmul.f32 0.07692308, %v358_v8  ;;  %v367_v39 = vmul.f32 0.07692308, %v359_v9  ;;  %v271_v25 = vrot.slane %v262_v32, 1  ;;  %v290_v28 = vrot.slane %v262_v32, 7 }
  0xd7   : > { %v398_v18 = vmax.f32 %v390_v2, 0.0  ;;  %v399_v19 = vmax.f32 %v391_v10, 0.0  ;;  %v329_v35 = vsel %vm305_vm2, %v312_v20, %v291_v17 }
  0xd8   : > { %v375_v21 = vsub.f32 %v822_v5, %v366_v16  ;;  %v376_v24 = vsub.f32 %v820_v4, %v367_v39  ;;  %v292_v27 = vsel %vm280_vm3, %v290_v28, %v291_v17  ;;  %v304_v12 = vsel %vm280_vm3, %v271_v25, %v290_v28 }
  0xd9   : > { %v406_v29 = vmin.f32 %v398_v18, 1.0  ;;  %v407_v30 = vmin.f32 %v399_v19, 1.0  ;;  %v336_v4 = vadd.f32 %v304_v12, %v262_v32  ;;  %v337_v5 = vadd.f32 %v292_v27, %v263_v58 }
  0xda   : > { %v384_v23 = vmul.f32 %v866_v40, %v375_v21  ;;  %v385_v15 = vmul.f32 %v866_v40, %v376_v24  ;;  %v313_v36 = vsel %vm305_vm2, %v271_v25, %v312_v20 }
  0xdb   : > { %415 = vst.msk [vmem:[%s912_s4 + $0x10] sm:$0xff] %vm412_vm4, %v406_v29  ;;  %416 = vst.msk [vmem:[%s912_s4 + $0x18] sm:$0xff] %vm412_vm4, %v407_v30  ;;  %v344_v37 = vadd.f32 %v336_v4, %v313_v36  ;;  %v345_v38 = vadd.f32 %v337_v5, %v329_v35 }
  0xdc   : > { %v392_v33 = vadd.f32 %v384_v23, %v366_v16  ;;  %v393_v34 = vadd.f32 %v385_v15, %v367_v39 }
  0xdd   : > { %v360_v43 = vadd.f32 %v352_v31, %v344_v37  ;;  %v361_v44 = vadd.f32 %v353_v13, %v345_v38 }
  0xde   : > { %v400_v41 = vmax.f32 %v392_v33, 0.0  ;;  %v401_v42 = vmax.f32 %v393_v34, 0.0 }
  0xdf   : > { %v368_v45 = vmul.f32 0.07692308, %v360_v43  ;;  %v369_v46 = vmul.f32 0.07692308, %v361_v44 }
  0xe0   : > { %v408_v1 = vmin.f32 %v400_v41, 1.0  ;;  %v409_v3 = vmin.f32 %v401_v42, 1.0 }
  0xe1   : > { %v377_v47 = vsub.f32 %v828_v7, %v368_v45  ;;  %v378_v48 = vsub.f32 %v826_v6, %v369_v46 }
  0xe2   : > { %417 = vst.msk [vmem:[%s912_s4 + $0x20] sm:$0xff] %vm412_vm4, %v408_v1  ;;  %418 = vst.msk [vmem:[%s912_s4 + $0x28] sm:$0xff] %vm412_vm4, %v409_v3 }
  0xe3   : > { %v386_v49 = vmul.f32 %v866_v40, %v377_v47  ;;  %v387_v50 = vmul.f32 %v866_v40, %v378_v48 }
  0xe5   : > { %v394_v51 = vadd.f32 %v386_v49, %v368_v45  ;;  %v395_v22 = vadd.f32 %v387_v50, %v369_v46 }
  0xe7   : > { %v402_v52 = vmax.f32 %v394_v51, 0.0  ;;  %v403_v26 = vmax.f32 %v395_v22, 0.0 }
  0xe9   : > { %v410_v6 = vmin.f32 %v402_v52, 1.0  ;;  %v411_v7 = vmin.f32 %v403_v26, 1.0 }
  0xeb   : > { %419 = vst.msk [vmem:[%s912_s4 + $0x30] sm:$0xff] %vm412_vm4, %v410_v6  ;;  %420 = vst.msk [vmem:[%s912_s4 + $0x38] sm:$0xff] %vm412_vm4, %v411_v7 }
  0xec   : > { %622 = shalt.err (!%p619_p10)
}
  0xed   : > { %s623_s24 = scalar_lea.hbm %s947_s10, 1024  ;;  %s627_s28 = scalar_lea.hbm %s998_s2, 2048 }
  0xee   : > { %p624_p0 = scmp.ne.s32.totalorder %s947_s10, %s623_s24  ;;  %p628_p1 = scmp.lt.s32.totalorder %s947_s10, %s998_s2 }
  0xef   : > { %p629_p3 = scmp.lt.s32.totalorder %s627_s28, %s623_s24 }
  0xf0   : > { %p625_p2 = pnand %p624_p0, %p1007_p12 }
  0xf1   : > { %p630_p6 = por %p629_p3, %p628_p1 }
  0xf2   : > { %p626_p9 = pneg %p625_p2 }
  0xf4   : > { %p631_p11 = pnand %p630_p6, %p626_p9 }
  0xf6   : > { %634 = shalt.err (!%p631_p11)
}
  0xf7   : > { %s681_s29 = smov 128   ;;  %s682_s21 = smov 8  }
  0xf8   : > { %531 = dma.vmem_to_hbm [thread:$0]  (%p1007_p12), %s949_s7, 1024, %s947_s10, %s422_s0, %s681_s29, %s681_s29, %s682_s21  }
  0xf9 PF: > { %s451_s3 = sand.u32 1, %s661_s11   ;;  %p1008_p13 = scmp.ne.s32.totalorder %s1004_s23, 0 }
  0xfa   : > { %p1009_p4 = scmp.ge.s32.totalorder %s673_s14, 2  ;;  %s452_s4 = scalar_lea.sflag [#allocation5], %s451_s3 }
  0xfc   : > { %p538_p5 = pnand %p1009_p4, %p1008_p13 }
  0xfe   : > { %p539_p7 = pneg %p538_p5 }
 0x100   : > { %656 = dma.done.wait (%p539_p7), %s452_s4, 1024  }
 0x101   : > { %658 = vsyncadd (%p539_p7), %s452_s4, 4294966272  ;;  %p16_p8 = scmp.ge.s32.totalorder %s726_s16, 4   ;;  %s1010_s11 = smov %s665_s12 }
 0x102   : > { %s1011_s12 = smov %s669_s13  ;;  %s1012_s13 = smov %s738_s19 }
 0x103   : > { %s1013_s14 = smov %s726_s16  ;;  %18 = sbr.rel (!%p16_p8) target bundleno = 7 (0x7), region = 73 }
 0x108   :  { %457 = vsyncpa [#allocation4], 1 }
 0x109   :  { %459 = vsyncpa [#allocation4 + $0x1], 1 }
 0x10a   :  { %460 = vsyncpa [#allocation5], 1 }
 0x10b   :  { %462 = vsyncpa [#allocation5 + $0x1], 1 }

</bundles_post_ra>
